<compile_context>
chip_gen: v7x
topology: tpu7x:2x2x1
jax: 0.10.0
libtpu: 0.0.40
codegen_flags: <defaults>
</compile_context>

<pallas_src>
import jax
import jax.numpy as jnp
from jax.experimental import pallas as pl
from jax.experimental.pallas import tpu as pltpu

HIDDEN = 100    # per-head hidden width of the original Net
HP = 128        # lane-padded per-head hidden width
OUT_PAD = 128   # lane-dense output slab width: [logits | zeros | value | zeros]
VCOL = 120      # slab column holding the value head (last 8-lane group)


def _net_kernel(x_ref, w1_ref, b1_ref, w2_ref, b2_ref, out_ref, val_ref):
    # x arrives as raw f32; cast to bf16 in-kernel (VPU slack) instead of a
    # separate wrapper-side pad+cast pass over HBM.
    xb = x_ref[...].astype(jnp.bfloat16)
    # Fused first layer: one MXU call computes both heads' hidden activations.
    h = jnp.dot(xb, w1_ref[...], preferred_element_type=jnp.float32)
    h = jnp.maximum(h + b1_ref[...], 0.0)                        # (tb, 2*HP) f32
    # Fused second layer: block-diagonal weight -> [logits | ... | value].
    out = jnp.dot(h.astype(jnp.bfloat16), w2_ref[...],
                  preferred_element_type=jnp.float32)
    out = out + b2_ref[...]                                      # (tb, OUT_PAD) f32
    out_ref[...] = out.astype(out_ref.dtype)     # bf16 slab: halves HBM writeback
    val_ref[...] = out[:, VCOL:VCOL + 8]         # critic column kept in f32


def net_forward(x, packed, *, block_b=1024):
    """Fused A3C Net forward. x: (B, s_dim) float32. Returns (logits, values)."""
    B, s_dim = x.shape
    a_dim = packed["a_dim"]
    w1, b1, w2, b2 = packed["w1"], packed["b1"], packed["w2"], packed["b2"]

    # Batch tile: 16-row aligned (bf16-friendly), capped at 4096 so the live
    # working set (~3 KB/row) stays well under v7x's smaller scoped VMEM.
    b_aligned = -(-B // 16) * 16
    tb = min(max(16, (min(block_b, 4096) // 16) * 16), b_aligned)
    # Guarantee >= 2 grid blocks when the batch permits so the "parallel"
    # batch axis actually spans both v7x TensorCores.
    if b_aligned // tb < 2 and b_aligned >= 32:
        tb = (-(-(b_aligned // 2) // 16)) * 16
    grid_b = -(-B // tb)

    out_slab, val = pl.pallas_call(
        _net_kernel,
        grid=(grid_b,),
        in_specs=[
            pl.BlockSpec((tb, s_dim), lambda i: (i, 0)),   # x tile (ragged OK)
            pl.BlockSpec(w1.shape, lambda i: (0, 0)),      # resident weights
            pl.BlockSpec(b1.shape, lambda i: (0, 0)),
            pl.BlockSpec(w2.shape, lambda i: (0, 0)),
            pl.BlockSpec(b2.shape, lambda i: (0, 0)),
        ],
        out_specs=(
            pl.BlockSpec((tb, OUT_PAD), lambda i: (i, 0)),  # bf16 logits slab
            pl.BlockSpec((tb, 8), lambda i: (i, 0)),        # f32 value (tiny)
        ),
        out_shape=(
            jax.ShapeDtypeStruct((B, OUT_PAD), jnp.bfloat16),
            jax.ShapeDtypeStruct((B, 8), jnp.float32),
        ),
        compiler_params=pltpu.CompilerParams(
            dimension_semantics=("parallel",)),
    )(x, w1, b1, w2, b2)

    logits = out_slab[:, :a_dim].astype(jnp.float32)
    values = val[:, :1]
    return logits, values


def init_params(key, s_dim, a_dim, hidden=HIDDEN):
    # set_init in the A3C reference: weights ~ N(0, 0.1), biases = 0.
    ks = jax.random.split(key, 4)
    return {
        "wpi1": 0.1 * jax.random.normal(ks[0], (s_dim, hidden), jnp.float32),
        "bpi1": jnp.zeros((1, hidden), jnp.float32),
        "wpi2": 0.1 * jax.random.normal(ks[1], (hidden, a_dim), jnp.float32),
        "bpi2": jnp.zeros((1, a_dim), jnp.float32),
        "wv1": 0.1 * jax.random.normal(ks[2], (s_dim, hidden), jnp.float32),
        "bv1": jnp.zeros((1, hidden), jnp.float32),
        "wv2": 0.1 * jax.random.normal(ks[3], (hidden, 1), jnp.float32),
        "bv2": jnp.zeros((1, 1), jnp.float32),
    }


def pack_params(p, a_dim):
    """Fuse + lane-pad the four Linear layers into two bf16 weights / two f32 biases."""
    s_dim, hidden = p["wpi1"].shape
    assert hidden <= HP and a_dim <= VCOL

    # Column-concatenated first layer: [policy hidden | value hidden], each
    # lane-padded to 128.
    w1 = jnp.zeros((s_dim, 2 * HP), jnp.float32)
    w1 = w1.at[:, :hidden].set(p["wpi1"])
    w1 = w1.at[:, HP:HP + hidden].set(p["wv1"])

    # Block-diagonal second layer: policy block feeds logits cols [0, a_dim),
    # value block feeds column VCOL; padded rows/cols are zero.
    w2 = jnp.zeros((2 * HP, OUT_PAD), jnp.float32)
    w2 = w2.at[:hidden, :a_dim].set(p["wpi2"])
    w2 = w2.at[HP:HP + hidden, VCOL:VCOL + 1].set(p["wv2"])

    b1 = jnp.zeros((1, 2 * HP), jnp.float32)
    b1 = b1.at[:, :hidden].set(p["bpi1"])
    b1 = b1.at[:, HP:HP + hidden].set(p["bv1"])

    b2 = jnp.zeros((1, OUT_PAD), jnp.float32)
    b2 = b2.at[:, :a_dim].set(p["bpi2"])
    b2 = b2.at[:, VCOL:VCOL + 1].set(p["bv2"])

    return {
        "w1": w1.astype(jnp.bfloat16), "b1": b1,
        "w2": w2.astype(jnp.bfloat16), "b2": b2,
        "a_dim": a_dim,
    }


def reference_forward_f32(x, p):
    """Pure-f32 PyTorch-semantics reference."""
    pi1 = jnp.maximum(x @ p["wpi1"] + p["bpi1"], 0.0)
    logits = pi1 @ p["wpi2"] + p["bpi2"]
    v1 = jnp.maximum(x @ p["wv1"] + p["bv1"], 0.0)
    values = v1 @ p["wv2"] + p["bv2"]
    return logits, values


def reference_forward_bf16(x, packed):
    """Reference emulating the kernel numerics (bf16 inputs/weights/hidden,
    f32 accumulate, bf16 logits store, f32 value store)."""
    xb = x.astype(jnp.bfloat16).astype(jnp.float32)
    w1 = packed["w1"].astype(jnp.float32)
    w2 = packed["w2"].astype(jnp.float32)
    h = jnp.maximum(xb @ w1 + packed["b1"], 0.0)
    hb = h.astype(jnp.bfloat16).astype(jnp.float32)
    out = hb @ w2 + packed["b2"]
    a_dim = packed["a_dim"]
    logits = out[:, :a_dim].astype(jnp.bfloat16).astype(jnp.float32)
    values = out[:, VCOL:VCOL + 1]
    return logits, values


if __name__ == "__main__":
    key = jax.random.PRNGKey(0)
    k_x, k_p, k_x2 = jax.random.split(key, 3)

    s_dim, a_dim = 16, 4  # small shapes consistent with Net(s_dim, a_dim)
    params = init_params(k_p, s_dim, a_dim)
    packed = pack_params(params, a_dim)

    # Small A3C-style batch: single (partial) tile, masked output store.
    B = 8
    x = jax.random.normal(k_x, (B, s_dim), jnp.float32)
    logits, values = net_forward(x, packed)
    jax.block_until_ready((logits, values))
    assert logits.shape == (B, a_dim)
    assert values.shape == (B, 1)

    # Tight check vs the bf16-emulating reference (same numerics as kernel).
    ref_l16, ref_v16 = reference_forward_bf16(x, packed)
    assert jnp.allclose(logits, ref_l16, atol=3e-2, rtol=3e-2)
    assert jnp.allclose(values, ref_v16, atol=5e-3, rtol=5e-3)

    # Loose check vs the original f32 PyTorch semantics (bf16 rounding only).
    ref_l32, ref_v32 = reference_forward_f32(x, params)
    assert jnp.allclose(logits, ref_l32, atol=6e-2, rtol=6e-2)
    assert jnp.allclose(values, ref_v32, atol=6e-2, rtol=6e-2)

    # Larger ragged batch: >= 2 grid blocks (exercises the v7x parallel split)
    # with a partial last block masked on store.
    B2 = 33
    x2 = jax.random.normal(k_x2, (B2, s_dim), jnp.float32)
    l2, v2 = net_forward(x2, packed)
    jax.block_until_ready((l2, v2))
    assert l2.shape == (B2, a_dim) and v2.shape == (B2, 1)
    r_l2, r_v2 = reference_forward_bf16(x2, packed)
    assert jnp.allclose(l2, r_l2, atol=3e-2, rtol=3e-2)
    assert jnp.allclose(v2, r_v2, atol=5e-3, rtol=5e-3)

    print("KERNEL_OK")
</pallas_src>

<mosaic_0001>
module attributes {stable_mosaic.version = 11 : i64} {
  func.func @_net_kernel(%arg0: i32, %arg1: memref<16x16xf32, #tpu.memory_space<vmem>>, %arg2: memref<16x256xbf16, #tpu.memory_space<vmem>>, %arg3: memref<1x256xf32, #tpu.memory_space<vmem>>, %arg4: memref<256x128xbf16, #tpu.memory_space<vmem>>, %arg5: memref<1x128xf32, #tpu.memory_space<vmem>>, %arg6: memref<16x128xbf16, #tpu.memory_space<vmem>>, %arg7: memref<16x8xf32, #tpu.memory_space<vmem>>) attributes {dimension_semantics = [#tpu.dimension_semantics<parallel>], iteration_bounds = array<i64: 1>, scalar_prefetch = 0 : i64, scratch_operands = 0 : i64, tpu.core_type = #tpu.core_type<tc>, window_params = [{transform_indices = @transform_0, window_bounds = array<i64: 16, 16>}, {pipeline_mode = #tpu.pipeline_mode<synchronous>, transform_indices = @transform_1, window_bounds = array<i64: 16, 256>}, {pipeline_mode = #tpu.pipeline_mode<synchronous>, transform_indices = @transform_2, window_bounds = array<i64: 1, 256>}, {pipeline_mode = #tpu.pipeline_mode<synchronous>, transform_indices = @transform_3, window_bounds = array<i64: 256, 128>}, {pipeline_mode = #tpu.pipeline_mode<synchronous>, transform_indices = @transform_4, window_bounds = array<i64: 1, 128>}, {transform_indices = @transform_5, window_bounds = array<i64: 16, 128>}, {transform_indices = @transform_6, window_bounds = array<i64: 16, 8>}]} {
    %c0 = arith.constant 0 : index
    %c0_0 = arith.constant 0 : index
    %0 = vector.load %arg1[%c0, %c0_0] : memref<16x16xf32, #tpu.memory_space<vmem>>, vector<16x16xf32>
    %1 = arith.truncf %0 : vector<16x16xf32> to vector<16x16xbf16>
    %c0_1 = arith.constant 0 : index
    %c0_2 = arith.constant 0 : index
    %2 = vector.load %arg2[%c0_1, %c0_2] : memref<16x256xbf16, #tpu.memory_space<vmem>>, vector<16x256xbf16>
    %cst = arith.constant dense<0.000000e+00> : vector<16x256xf32>
    %3 = tpu.matmul %1, %2, %cst {dimension_numbers = #tpu.dot_dimension_numbers<[1], [0], [0], [1], [0, 0, 1, 1], [], []>} : vector<16x16xbf16>, vector<16x256xbf16>, vector<16x256xf32> -> vector<16x256xf32>
    %c0_3 = arith.constant 0 : index
    %c0_4 = arith.constant 0 : index
    %4 = vector.load %arg3[%c0_3, %c0_4] : memref<1x256xf32, #tpu.memory_space<vmem>>, vector<1x256xf32>
    %5 = vector.broadcast %4 : vector<1x256xf32> to vector<16x256xf32>
    %6 = arith.addf %3, %5 : vector<16x256xf32>
    %cst_5 = arith.constant 0.000000e+00 : f32
    %7 = vector.broadcast %cst_5 : f32 to vector<16x256xf32>
    %8 = arith.maximumf %6, %7 : vector<16x256xf32>
    %9 = arith.truncf %8 : vector<16x256xf32> to vector<16x256xbf16>
    %c0_6 = arith.constant 0 : index
    %c0_7 = arith.constant 0 : index
    %10 = vector.load %arg4[%c0_6, %c0_7] : memref<256x128xbf16, #tpu.memory_space<vmem>>, vector<256x128xbf16>
    %cst_8 = arith.constant dense<0.000000e+00> : vector<16x128xf32>
    %11 = tpu.matmul %9, %10, %cst_8 {dimension_numbers = #tpu.dot_dimension_numbers<[1], [0], [0], [1], [0, 0, 1, 1], [], []>} : vector<16x256xbf16>, vector<256x128xbf16>, vector<16x128xf32> -> vector<16x128xf32>
    %c0_9 = arith.constant 0 : index
    %c0_10 = arith.constant 0 : index
    %12 = vector.load %arg5[%c0_9, %c0_10] : memref<1x128xf32, #tpu.memory_space<vmem>>, vector<1x128xf32>
    %13 = vector.broadcast %12 : vector<1x128xf32> to vector<16x128xf32>
    %14 = arith.addf %11, %13 : vector<16x128xf32>
    %15 = arith.truncf %14 : vector<16x128xf32> to vector<16x128xbf16>
    %c0_11 = arith.constant 0 : index
    %c0_12 = arith.constant 0 : index
    %16 = vector.load %arg6[%c0_11, %c0_12] : memref<16x128xbf16, #tpu.memory_space<vmem>>, vector<16x128xbf16>
    tpu.vector_store %arg6[%c0_11, %c0_12], %15 {strides = array<i32>} : memref<16x128xbf16, #tpu.memory_space<vmem>>, vector<16x128xbf16>,
    %17 = vector.extract_strided_slice %14 {offsets = [0, 120], sizes = [16, 8], strides = [1, 1]} : vector<16x128xf32> to vector<16x8xf32>
    %c0_13 = arith.constant 0 : index
    %c0_14 = arith.constant 0 : index
    %18 = vector.load %arg7[%c0_13, %c0_14] : memref<16x8xf32, #tpu.memory_space<vmem>>, vector<16x8xf32>
    tpu.vector_store %arg7[%c0_13, %c0_14], %17 {strides = array<i32>} : memref<16x8xf32, #tpu.memory_space<vmem>>, vector<16x8xf32>,
    return
  }
  func.func @transform_0(%arg0: i32) -> (i32, i32) {
    %c0_i32 = arith.constant 0 : i32
    %c0_i32_0 = arith.constant 0 : i32
    return %arg0, %c0_i32 : i32, i32
  }
  func.func @transform_1(%arg0: i32) -> (i32, i32) {
    %c0_i32 = arith.constant 0 : i32
    %c0_i32_0 = arith.constant 0 : i32
    %c0_i32_1 = arith.constant 0 : i32
    return %c0_i32, %c0_i32_0 : i32, i32
  }
  func.func @transform_2(%arg0: i32) -> (i32, i32) {
    %c0_i32 = arith.constant 0 : i32
    %c0_i32_0 = arith.constant 0 : i32
    %c0_i32_1 = arith.constant 0 : i32
    return %c0_i32, %c0_i32_0 : i32, i32
  }
  func.func @transform_3(%arg0: i32) -> (i32, i32) {
    %c0_i32 = arith.constant 0 : i32
    %c0_i32_0 = arith.constant 0 : i32
    %c0_i32_1 = arith.constant 0 : i32
    return %c0_i32, %c0_i32_0 : i32, i32
  }
  func.func @transform_4(%arg0: i32) -> (i32, i32) {
    %c0_i32 = arith.constant 0 : i32
    %c0_i32_0 = arith.constant 0 : i32
    %c0_i32_1 = arith.constant 0 : i32
    return %c0_i32, %c0_i32_0 : i32, i32
  }
  func.func @transform_5(%arg0: i32) -> (i32, i32) {
    %c0_i32 = arith.constant 0 : i32
    %c0_i32_0 = arith.constant 0 : i32
    return %arg0, %c0_i32 : i32, i32
  }
  func.func @transform_6(%arg0: i32) -> (i32, i32) {
    %c0_i32 = arith.constant 0 : i32
    %c0_i32_0 = arith.constant 0 : i32
    return %arg0, %c0_i32 : i32, i32
  }
}

</mosaic_0001>

<bundles_post_ra>
// kernel: tpu_custom_call.1
= control target key start
LH: loop header
LB: loop body
LE: loop exit
PB: predicated region body
PF: predicated region fallthrough
CT: control target
= control target key end

     0   :  { %12 = vsyncpa [#allocation3], 0  ;;  %s711_s0 = inlined_call_operand.hbm [shape: f32[8,16], index: 0, kind: input, shape index: {}]   ;;  %s712_s1 = inlined_call_operand.hbm [shape: bf16[16,256], index: 1, kind: input, shape index: {}]   ;;  %s713_s2 = inlined_call_operand.vmem [shape: f32[1,256], index: 2, kind: input, shape index: {}]   ;;  %s714_s3 = inlined_call_operand.hbm [shape: bf16[256,128], index: 3, kind: input, shape index: {}]   ;;  %s715_s4 = inlined_call_operand.vmem [shape: f32[1,128], index: 4, kind: input, shape index: {}]   ;;  %s716_s5 = inlined_call_operand.hbm [shape: bf16[8,128], index: 5, kind: output, shape index: {0}]   ;;  %s717_s6 = inlined_call_operand.hbm [shape: f32[8,8], index: 6, kind: output, shape index: {1}]  }
   0x1   :  { %13 = vsyncpa [#allocation6], 0 }
   0x2   :  { %14 = vsyncpa [#allocation4], 0 }
   0x3   :  { %15 = vsyncpa [#allocation10], 0 }
   0x4   :  { %20 = vsyncadd [#allocation3], 128  ;;  %s575_s21 = smov [#allocation5]   ;;  %s576_s23 = smov [#allocation2]  }
   0x5   :  { %s33_s22 = sshll.u32 %s575_s21, 4  ;;  %s21_s24 = sshll.u32 %s576_s23, 4  ;;  %s34_s22 = int_to_ptr.vmem [resolvable:$true] %s33_s22  ;;  %s620_s24 = int_to_ptr.vmem [resolvable:$true] %s21_s24 }
   0x6   :  { %s457_s27 = scalar_lea.hbm %s712_s1, 256 }
   0x7   :  { %p458_p0 = scmp.ne.s32.totalorder %s712_s1, %s457_s27  ;;  %p461_p1 = scmp.lt.u32.totalorder %s457_s27, %s712_s1 }
   0x9   :  { %p463_p2 = pnand %p461_p1, %p458_p0 }
   0xb   :  { %466 = shalt.err (!%p463_p2)
}
   0xc   :  { %s467_s8 = scalar_lea.vmem %s34_s22, 256  ;;  %p472_p4 = scmp.lt.s32.totalorder %s34_s22, %s34_s22 }
   0xd   :  { %p468_p3 = scmp.ne.s32.totalorder %s34_s22, %s467_s8  ;;  %p473_p5 = scmp.lt.s32.totalorder %s467_s8, %s467_s8 }
   0xf   :  { %p474_p6 = por %p473_p5, %p472_p4 }
  0x11   :  { %p475_p7 = pnand %p474_p6, %p468_p3 }
  0x13   :  { %478 = shalt.err (!%p475_p7)
}
  0x14   :  { %s577_s9 = smov 128   ;;  %s578_s10 = smov 8  }
  0x15   :  { %39 = dma.hbm_to_vmem [thread:$0]  %s712_s1, 256, %s34_s22, [#allocation6], %s577_s9, %s577_s9, %s578_s10  }
  0x16   :  { %s479_s15 = scalar_lea.hbm %s711_s0, 128 }
  0x17   :  { %p480_p8 = scmp.ne.s32.totalorder %s711_s0, %s479_s15  ;;  %p483_p9 = scmp.lt.u32.totalorder %s479_s15, %s711_s0 }
  0x19   :  { %p485_p10 = pnand %p483_p9, %p480_p8 }
  0x1b   :  { %488 = shalt.err (!%p485_p10)
}
  0x1c   :  { %s489_s20 = scalar_lea.vmem %s620_s24, 128  ;;  %s493_s1 = scalar_lea.vmem %s620_s24, 256 }
  0x1d   :  { %p490_p11 = scmp.ne.s32.totalorder %s620_s24, %s489_s20  ;;  %p494_p12 = scmp.lt.s32.totalorder %s620_s24, %s620_s24 }
  0x1e   :  { %p495_p13 = scmp.lt.s32.totalorder %s493_s1, %s489_s20 }
  0x20   :  { %p496_p0 = por %p495_p13, %p494_p12 }
  0x22   :  { %p497_p1 = pnand %p496_p0, %p490_p11 }
  0x24   :  { %500 = shalt.err (!%p497_p1)
}
  0x25   :  { %27 = dma.hbm_to_vmem [thread:$0]  %s711_s0, 128, %s620_s24, [#allocation3], %s577_s9, %s577_s9, %s578_s10  }
  0x26   :  { %s579_s23 = smov [#allocation7]   ;;  %s501_s28 = scalar_lea.hbm %s714_s3, 2048 }
  0x27   :  { %s47_s25 = sshll.u32 %s579_s23, 4  ;;  %p502_p2 = scmp.ne.s32.totalorder %s714_s3, %s501_s28  ;;  %s48_s25 = int_to_ptr.vmem [resolvable:$true] %s47_s25 }
  0x28   :  { %p505_p3 = scmp.lt.u32.totalorder %s501_s28, %s714_s3 }
  0x2a   :  { %p507_p4 = pnand %p505_p3, %p502_p2 }
  0x2c   :  { %510 = shalt.err (!%p507_p4)
}
  0x2d   :  { %s511_s11 = scalar_lea.vmem %s48_s25, 2048  ;;  %p516_p6 = scmp.lt.s32.totalorder %s48_s25, %s48_s25 }
  0x2e   :  { %p512_p5 = scmp.ne.s32.totalorder %s48_s25, %s511_s11  ;;  %p517_p7 = scmp.lt.s32.totalorder %s511_s11, %s511_s11 }
  0x30   :  { %p518_p8 = por %p517_p7, %p516_p6 }
  0x32   :  { %p519_p9 = pnand %p518_p8, %p512_p5 }
  0x34   :  { %522 = shalt.err (!%p519_p9)
}
  0x35   :  { %s580_s0 = smov 64   ;;  %s581_s24 = smov 4  }
  0x36   :  { %53 = dma.hbm_to_vmem [thread:$0]  %s714_s3, 2048, %s48_s25, [#allocation6], %s580_s0, %s580_s0, %s581_s24  }
  0x37   :  { %567 = dma.done.wait [#allocation3], 256  }
  0x38   :  { %568 = vsyncadd [#allocation3], 4294967040 }
  0x39   :  { %569 = dma.done.wait [#allocation6], 2304  }
  0x3a   :  { %570 = vsyncadd [#allocation6], 4294964992  ;;  %v582_v0 = vmov 0   ;;  %v438_v1 = vld [vmem:[#allocation5 + $0x4] ss:$8 sps:$4 sm:$0xff]   ;;  %v66_v3 = vld [vmem:[#allocation2] sm:$0xff]  ;;  %v73_v22 = vlaneseq }
  0x3b   :  { %129 = vmatprep.mubr.bf16.mxu0 %v582_v0  ;;  %v440_v2 = vld [vmem:[#allocation5] ss:$8 sps:$4 sm:$0xff]   ;;  %v67_v4 = vld [vmem:[#allocation2 + $0x8] sm:$0xff]  ;;  %97 = vmatprep.subr.bf16.mxu0 %v438_v1  ;;  %v441_v6 = vld [vmem:[#allocation7 + $0x40] sm:$0xff]   ;;  %vm93_vm0 = vcmask 130048   ;;  %vm340_vm1 = vcmask 64512  }
  0x3c   :  { %v68_v5 = vpack.c.bf16 %v67_v4, %v66_v3  ;;  %98 = vmatpush1.bf16.msra.mxu0 %v440_v2  ;;  %v442_v7 = vld [vmem:[#allocation7] sm:$0xff]   ;;  %406 = vmatprep.subr.bf16.mxu1 %v441_v6  ;;  %v443_v8 = vld [vmem:[#allocation7 + $0x48] sm:$0xff]   ;;  %v445_v10 = vld [vmem:[#allocation7 + $0x50] sm:$0xff]   ;;  %v74_v23 = vshrl.u32 %v73_v22, 7 }
  0x3d   :  { %407 = vmatpush3.bf16.msra.mxu1 %v442_v7  ;;  %v444_v9 = vld [vmem:[#allocation7 + $0x8] sm:$0xff]   ;;  %v446_v11 = vld [vmem:[#allocation7 + $0x10] sm:$0xff]   ;;  %v447_v12 = vld [vmem:[#allocation7 + $0x58] sm:$0xff]  }
  0x3e   :  { %408 = vmatprep.subr.bf16.mxu1 %v443_v8  ;;  %v448_v13 = vld [vmem:[#allocation7 + $0x18] sm:$0xff]   ;;  %v449_v14 = vld [vmem:[#allocation7 + $0x60] sm:$0xff]   ;;  %v451_v16 = vld [vmem:[#allocation7 + $0x68] sm:$0xff]   ;;  %v75_v24 = vsub.s32 0, %v74_v23  ;;  %v79_v26 = vsub.s32 1, %v74_v23 }
  0x3f   :  { %379 = vmatmul.mubr.msk.bf16.vlgmr.msra.gmra.mrb[0].mxu0 %vm93_vm0, %v68_v5  ;;  %v450_v15 = vld [vmem:[#allocation7 + $0x20] sm:$0xff]   ;;  %v452_v17 = vld [vmem:[#allocation7 + $0x28] sm:$0xff]   ;;  %v453_v18 = vld [vmem:[#allocation7 + $0x70] sm:$0xff]  }
  0x40   :  { %v454_v19 = vld [vmem:[#allocation7 + $0x30] sm:$0xff]   ;;  %v455_v20 = vld [vmem:[#allocation7 + $0x78] sm:$0xff]   ;;  %v71_v25 = vld [vmem:[%s713_s2] sm:$0x3] }
  0x41   :  { %409 = vmatpush3.bf16.msra.mxu1 %v444_v9  ;;  %v456_v21 = vld [vmem:[#allocation7 + $0x38] sm:$0xff]   ;;  %v76_v27 = vrot.slane %v71_v25, %v75_v24  ;;  %v80_v28 = vrot.slane %v71_v25, %v79_v26  ;;  %v380_v45 = vld [vmem:[%s715_s4] ss:$0 sm:$0xff] }
  0x42   :  { %410 = vmatprep.subr.bf16.mxu1 %v445_v10 }
  0x45   :  { %411 = vmatpush3.bf16.msra.mxu1 %v446_v11 }
  0x46   :  { %412 = vmatprep.subr.bf16.mxu1 %v447_v12 }
  0x49   :  { %413 = vmatpush3.bf16.msra.mxu1 %v448_v13 }
  0x4a   :  { %414 = vmatprep.subr.bf16.mxu1 %v449_v14 }
  0x4d   :  { %415 = vmatpush3.bf16.msra.mxu1 %v450_v15 }
  0x4e   :  { %416 = vmatprep.subr.bf16.mxu1 %v451_v16 }
  0x51   :  { %417 = vmatpush3.bf16.msra.mxu1 %v452_v17 }
  0x52   :  { %418 = vmatprep.subr.bf16.mxu1 %v453_v18 }
  0x55   :  { %419 = vmatpush3.bf16.msra.mxu1 %v454_v19 }
  0x56   :  { %420 = vmatprep.subr.bf16.mxu1 %v455_v20 }
  0x59   :  { %421 = vmatpush3.bf16.msra.mxu1 %v456_v21 }
 0x112   :  { %v131_v29 = vpop.f32.mrb[0].mxu0 }
 0x113   :  { %v132_v30 = vadd.f32 %v131_v29, %v76_v27  ;;  %v133_v31 = vpop.f32.mrb[1].mxu0 }
 0x114   :  { %v134_v32 = vadd.f32 %v133_v31, %v80_v28  ;;  %v135_v33 = vpop.f32.mrb[2].mxu0 }
 0x115   :  { %v136_v34 = vadd.f32 %v135_v33, %v76_v27  ;;  %v137_v35 = vpop.f32.mrb[3].mxu0  ;;  %v140_v37 = vmax.f32 %v132_v30, 0.0 }
 0x116   :  { %v138_v36 = vadd.f32 %v137_v35, %v80_v28  ;;  %v141_v39 = vmax.f32 %v134_v32, 0.0 }
 0x117   :  { %v142_v38 = vmax.f32 %v136_v34, 0.0 }
 0x118   :  { %v143_v40 = vmax.f32 %v138_v36, 0.0 }
 0x119   :  { %v144_v41 = vpack.c.bf16 %v142_v38, %v140_v37 }
 0x11a   :  { %v145_v42 = vpack.c.bf16 %v143_v40, %v141_v39 }
 0x11c   :  { %313 = vmatprep.mubr.bf16.mxu1 %v145_v42 }
 0x11d   :  { %314 = vmatmul.mubr.bf16.vlgmr.msra.gmra.mrb[0].mxu1 %v144_v41 }
 0x1f0   :  { %v422_v43 = vpop.f32.mrb[0].mxu1 }
 0x1f1   :  { %v423_v44 = vpop.f32.mrb[1].mxu1 }
 0x1f2   :  { %v424_v46 = vadd.f32 %v423_v44, %v422_v43  ;;  %v425_v47 = vpop.f32.mrb[2].mxu1 }
 0x1f3   :  { %v426_v48 = vpop.f32.mrb[3].mxu1 }
 0x1f4   :  { %v427_v49 = vadd.f32 %v426_v48, %v425_v47  ;;  %v316_v50 = vadd.f32 %v424_v46, %v380_v45 }
 0x1f6   :  { %334 = vrot.lane.b32.xlu0 %v316_v50, %s578_s10  ;;  %v319_v51 = vadd.f32 %v427_v49, %v380_v45 }
 0x1f8   :  { %v404_v52 = vpack.c.bf16 %v319_v51, %v316_v50 }
 0x1fa   :  { %336 = vrot.lane.b32.xlu0 %v319_v51, %s578_s10  ;;  %405 = vst [vmem:[#allocation8] sm:$0xff] %v404_v52  }
 0x268   :  { %v335_v53 = vpop.permute.xlu0 %334 }
 0x269   :  { %341 = vst.msk [vmem:[#allocation9] sm:$0xff] %vm340_vm1, %v335_v53 }
 0x26c   :  { %v337_v54 = vpop.permute.xlu0 %336 }
 0x26d   :  { %342 = vst.msk [vmem:[#allocation9 + $0x8] sm:$0xff] %vm340_vm1, %v337_v54 }
 0x26e   :  { %347 = vsyncadd [#allocation4], 64  ;;  %s583_s16 = smov [#allocation8]  }
 0x26f   :  { %s348_s4 = sshll.u32 %s583_s16, 4  ;;  %s349_s4 = int_to_ptr.vmem [resolvable:$true] %s348_s4 }
 0x270   :  { %s523_s17 = scalar_lea.vmem %s349_s4, 64  ;;  %s527_s18 = scalar_lea.vmem %s349_s4, 128 }
 0x271   :  { %p524_p10 = scmp.ne.s32.totalorder %s349_s4, %s523_s17  ;;  %p528_p11 = scmp.lt.s32.totalorder %s349_s4, %s349_s4 }
 0x272   :  { %p529_p12 = scmp.lt.s32.totalorder %s527_s18, %s523_s17 }
 0x274   :  { %p530_p13 = por %p529_p12, %p528_p11 }
 0x276   :  { %p531_p0 = pnand %p530_p13, %p524_p10 }
 0x278   :  { %534 = shalt.err (!%p531_p0)
}
 0x279   :  { %s535_s1 = scalar_lea.hbm %s716_s5, 64 }
 0x27a   :  { %p536_p1 = scmp.ne.s32.totalorder %s716_s5, %s535_s1  ;;  %p539_p2 = scmp.lt.u32.totalorder %s535_s1, %s716_s5 }
 0x27c   :  { %p541_p3 = pnand %p539_p2, %p536_p1 }
 0x27e   :  { %544 = shalt.err (!%p541_p3)
}
 0x27f   :  { %354 = dma.vmem_to_hbm [thread:$0]  %s349_s4, 64, %s716_s5, [#allocation4], %s580_s0, %s580_s0, %s581_s24  }
 0x280   :  { %359 = vsyncadd [#allocation10], 128  ;;  %s584_s28 = smov [#allocation9]  }
 0x281   :  { %s360_s29 = sshll.u32 %s584_s28, 4  ;;  %s361_s29 = int_to_ptr.vmem [resolvable:$true] %s360_s29 }
 0x282   :  { %s545_s30 = scalar_lea.vmem %s361_s29, 128  ;;  %s549_s7 = scalar_lea.vmem %s361_s29, 256 }
 0x283   :  { %p546_p4 = scmp.ne.s32.totalorder %s361_s29, %s545_s30  ;;  %p550_p5 = scmp.lt.s32.totalorder %s361_s29, %s361_s29 }
 0x284   :  { %p551_p6 = scmp.lt.s32.totalorder %s549_s7, %s545_s30 }
 0x286   :  { %p552_p7 = por %p551_p6, %p550_p5 }
 0x288   :  { %p553_p8 = pnand %p552_p7, %p546_p4 }
 0x28a   :  { %556 = shalt.err (!%p553_p8)
}
 0x28b   :  { %s557_s12 = scalar_lea.hbm %s717_s6, 128 }
 0x28c   :  { %p558_p9 = scmp.ne.s32.totalorder %s717_s6, %s557_s12  ;;  %p561_p10 = scmp.lt.u32.totalorder %s557_s12, %s717_s6 }
 0x28e   :  { %p563_p11 = pnand %p561_p10, %p558_p9 }
 0x290   :  { %566 = shalt.err (!%p563_p11)
}
 0x291   :  { %366 = dma.vmem_to_hbm [thread:$0]  %s361_s29, 128, %s717_s6, [#allocation10], %s577_s9, %s577_s9, %s578_s10  }
 0x292   :  { %571 = dma.done.wait [#allocation4], 128  }
 0x293   :  { %572 = vsyncadd [#allocation4], 4294967168 }
 0x294   :  { %573 = dma.done.wait [#allocation10], 256  }
 0x295   :  { %574 = vsyncadd [#allocation10], 4294967040 }
 0x296   :  { %373 = vsyncpa [#allocation3], 1 }
 0x297   :  { %374 = vsyncpa [#allocation6], 1 }
 0x298   :  { %375 = vsyncpa [#allocation4], 1 }
 0x299   :  { %376 = vsyncpa [#allocation10], 1 }

</bundles_post_ra>
